<compile_context>
chip_gen: v7x
topology: tpu7x:2x2x1
jax: 0.10.0
libtpu: 0.0.40
codegen_flags: <defaults>
</compile_context>

<pallas_src>
import functools

import jax
import jax.numpy as jnp
import numpy as np
from jax.experimental import pallas as pl
from jax.experimental.pallas import tpu as pltpu

EPS = 1e-5  # nn.LayerNorm default eps


def _channel_block_kernel(xq_ref, ykv_ref, cred_ref, g_ref, b_ref,
                          qwt_ref, kvwt_ref, rep_ref, seg_ref, segt_ref,
                          grp_ref, bsum_ref, w2p_ref, pb_ref, o_ref,
                          *, B, HW, scale):
    f32 = jnp.float32
    bf16 = jnp.bfloat16

    xq = xq_ref[...]      # (B*C, HW) f32
    ykv = ykv_ref[...]    # (B*C, HW) f32

    # --- 1x1 conv over channels, batched as one MXU matmul: (B, B*C) @ (B*C, HW).
    # conv weight is folded into cred; conv bias dropped (exact no-op under LayerNorm).
    pool = jnp.dot(cred_ref[...], xq, preferred_element_type=f32)            # (B, HW)

    # --- shared LayerNorm (norm1) over the HW axis, f32 statistics ---
    gamma = g_ref[...]
    beta = b_ref[...]

    def layer_norm(t):
        m = jnp.mean(t, axis=-1, keepdims=True)
        v = jnp.mean(jnp.square(t - m), axis=-1, keepdims=True)
        return (t - m) * jax.lax.rsqrt(v + EPS) * gamma + beta

    qn = layer_norm(pool)   # (B, HW)
    yn = layer_norm(ykv)    # (B*C, HW)

    # --- q / kv projections: batched MXU matmuls, bf16 operands, f32 accumulate ---
    q = jnp.dot(qn.astype(bf16), qwt_ref[...], preferred_element_type=f32)    # (B, HW)
    kv = jnp.dot(yn.astype(bf16), kvwt_ref[...], preferred_element_type=f32)  # (B*C, 2*HW)
    k = kv[:, :HW]    # (B*C, HW)
    v = kv[:, HW:]    # (B*C, HW)

    # --- per-head scores for all batches / heads at once ---
    # qrep[b*C+c, :] = q[b, :]  (row replication via tiny 0/1 matmul)
    qrep = jnp.dot(rep_ref[...], q, preferred_element_type=f32)                   # (B*C, HW)
    # scores[b*C+c, h] = sum_d q[b, h*hd+d] * k[b*C+c, h*hd+d]  (segment-sum matmul)
    scores = jnp.dot(qrep * k, seg_ref[...], preferred_element_type=f32) * scale  # (B*C, H)

    # --- softmax over the C channel tokens per batch group, fully vectorised.
    # The global column max is a valid shift for every group (softmax is shift-invariant),
    # so no per-group slicing is needed.
    m = jnp.max(scores, axis=0, keepdims=True)                                     # (1, H)
    e = jnp.exp(scores - m)                                                        # (B*C, H)
    den = jnp.dot(bsum_ref[...], e, preferred_element_type=f32)   # per-group sum, broadcast
    attn = e / den                                                                 # (B*C, H)

    # --- attention-weighted value sum for all heads, lane-dense ---
    # attn_exp[b*C+c, h*hd+d] = attn[b*C+c, h]   (segment broadcast via matmul)
    attn_exp = jnp.dot(attn, segt_ref[...], preferred_element_type=f32)           # (B*C, HW)
    # heads[b, h*hd+d] = sum_c attn * v          (per-batch group sum via matmul)
    heads = jnp.dot(grp_ref[...], attn_exp * v, preferred_element_type=f32)       # (B, HW)

    # --- PyTorch batch/head remix + output projection, without the B^2-sized weight.
    # Identity (valid for num_heads % B == 0):
    #   xproj[b', :] = sum_r heads[r, b'*HW/B:(b'+1)*HW/B] @ pwt_r
    # where pwt_r are row blocks of the proj weight; the stacked, row-permuted weight W'
    # is built on the host.  The LHS is a 128-lane-aligned block transpose of `heads`
    # (B^2 static slices), kept in (B, HW) sublane-major form.
    blk = HW // B
    lhs_rows = []
    for bp in range(B):
        lhs_rows.append(jnp.concatenate(
            [heads[r:r + 1, bp * blk:(bp + 1) * blk] for r in range(B)], axis=1))
    lhs = jnp.concatenate(lhs_rows, axis=0)                                        # (B, HW)

    xp = jnp.dot(lhs.astype(bf16), w2p_ref[...],
                 preferred_element_type=f32) + pb_ref[...]                         # (B, HW)

    # --- channel gating: out[b*C+c, :] = xproj[b, :] * y_kv[b*C+c, :] (one dense store) ---
    xp_bc = jnp.dot(rep_ref[...], xp, preferred_element_type=f32)                  # (B*C, HW)
    o_ref[...] = xp_bc * ykv


@functools.lru_cache(maxsize=None)
def _structural_mats(B, C, HW, num_heads):
    """Host-built 0/1 structural matrices + remix row permutation (built once per shape)."""
    hd = HW // num_heads
    grp = np.kron(np.eye(B, dtype=np.float32),
                  np.ones((1, C), np.float32))                       # (B, B*C)   group-sum
    rep = np.ascontiguousarray(grp.T)                                # (B*C, B)   row replication
    bsum = np.kron(np.eye(B, dtype=np.float32),
                   np.ones((C, C), np.float32))                      # (B*C, B*C) group-sum bcast
    seg = (np.arange(HW)[:, None] // hd ==
           np.arange(num_heads)[None, :]).astype(np.float32)         # (HW, H)    segment-sum
    segt = np.ascontiguousarray(seg.T)                               # (H, HW)    segment-bcast

    # Row permutation of the (HW, HW) proj weight that folds PyTorch's
    # (1,B,H,1,hd).transpose(1,2).reshape(B,1,HW) remix (no size increase):
    #   W'[r*(HW/B) + t*hd + d, :] = pwt[(t*B + r)*hd + d, :]
    r_idx = np.repeat(np.arange(B), HW // B)
    t_idx = np.tile(np.repeat(np.arange(num_heads // B), hd), B)
    d_idx = np.tile(np.arange(hd), (num_heads // B) * B)
    row_perm = (t_idx * B + r_idx) * hd + d_idx                      # permutation of [0, HW)
    return grp, rep, bsum, seg, segt, row_perm


@functools.partial(jax.jit, static_argnames=("num_heads",))
def channel_block_forward(x_q, y_kv, params, num_heads=8):
    B, C, H, W = y_kv.shape
    HW = H * W
    assert HW % num_heads == 0
    hd = HW // num_heads
    # TODO(synk): the remix->proj row-permutation factorization assumes num_heads % B == 0
    # (true for this module's shapes); general B would need a per-head-chunk relayout fallback.
    assert num_heads % B == 0
    scale = hd ** (-0.5)
    BC = B * C

    grp_np, rep_np, bsum_np, seg_np, segt_np, row_perm = _structural_mats(B, C, HW, num_heads)

    xq2 = x_q.reshape(BC, HW).astype(jnp.float32)
    ykv2 = y_kv.reshape(BC, HW).astype(jnp.float32)

    cw = params["conv_w"].reshape(C).astype(jnp.float32)
    gamma = params["ln_w"].reshape(1, HW).astype(jnp.float32)
    beta = params["ln_b"].reshape(1, HW).astype(jnp.float32)
    qwt = params["q_w"].T.astype(jnp.bfloat16)                    # (HW, HW)
    kvwt = params["kv_w"].T.astype(jnp.bfloat16)                  # (HW, 2*HW)
    w2p = params["proj_w"].T[row_perm, :].astype(jnp.bfloat16)    # (HW, HW), remix-permuted rows
    pb = params["proj_b"].reshape(1, HW).astype(jnp.float32)

    # 1x1 conv as a channel-reduction matmul: cred[b, b*C + c] = conv_w[c]
    cred = jnp.asarray(grp_np) * jnp.tile(cw, B)[None, :]         # (B, B*C)
    # conv bias intentionally not passed: exact no-op under the shared LayerNorm.

    def full(shape):
        return pl.BlockSpec(shape, lambda i: (0,) * len(shape))

    out2 = pl.pallas_call(
        functools.partial(_channel_block_kernel, B=B, HW=HW, scale=scale),
        out_shape=jax.ShapeDtypeStruct((BC, HW), jnp.float32),
        grid=(1,),
        in_specs=[
            full((BC, HW)),            # x_q (flattened)
            full((BC, HW)),            # y_kv (flattened)
            full((B, BC)),             # conv reduction matrix
            full((1, HW)),             # LN gamma
            full((1, HW)),             # LN beta
            full((HW, HW)),            # q weight^T (bf16)
            full((HW, 2 * HW)),        # kv weight^T (bf16)
            full((BC, B)),             # row replication
            full((HW, num_heads)),     # head segment-sum
            full((num_heads, HW)),     # head segment-broadcast
            full((B, BC)),             # per-batch group-sum
            full((BC, BC)),            # block-diag group-sum broadcast (softmax denom)
            full((HW, HW)),            # remix-permuted proj weight (bf16)
            full((1, HW)),             # proj bias
        ],
        out_specs=full((BC, HW)),
        compiler_params=pltpu.CompilerParams(dimension_semantics=("arbitrary",)),
    )(xq2, ykv2, cred, gamma, beta, qwt, kvwt,
      jnp.asarray(rep_np), jnp.asarray(seg_np), jnp.asarray(segt_np),
      jnp.asarray(grp_np), jnp.asarray(bsum_np), w2p, pb)

    return out2.reshape(B, C, H, W)


def reference_forward(x_q, y_kv, params, num_heads=8):
    """Pure-JAX transcription of the PyTorch forward (numerical cross-check, all f32)."""
    B, C, H, W = y_kv.shape
    HW = H * W
    hd = HW // num_heads
    scale = hd ** (-0.5)

    pool_q = (jnp.einsum("bchw,c->bhw", x_q, params["conv_w"])
              + params["conv_b"]).reshape(B, 1, HW)
    ykv = y_kv.reshape(B, C, HW)

    def ln(t):
        m = t.mean(-1, keepdims=True)
        v = ((t - m) ** 2).mean(-1, keepdims=True)
        return (t - m) / jnp.sqrt(v + EPS) * params["ln_w"] + params["ln_b"]

    qn, yn = ln(pool_q), ln(ykv)
    q = qn @ params["q_w"].T                                   # (B, 1, HW)
    kv = yn @ params["kv_w"].T                                 # (B, C, 2*HW)
    q5 = q.reshape(B, 1, 1, num_heads, hd).transpose(2, 0, 3, 1, 4)    # (1,B,H,1,hd)
    kv5 = kv.reshape(B, C, 2, num_heads, hd).transpose(2, 0, 3, 1, 4)  # (2,B,H,C,hd)
    k, v = kv5[0], kv5[1]
    attn = (q5 @ jnp.swapaxes(k, -2, -1)) * scale              # (1,B,H,1,C)
    attn = jax.nn.softmax(attn, axis=-1)
    x = attn @ v                                               # (1,B,H,1,hd)
    x = jnp.swapaxes(x, 1, 2).reshape(B, 1, HW)                # PyTorch's reshape, verbatim
    x = x @ params["proj_w"].T + params["proj_b"]
    out = x * ykv
    return out.reshape(B, C, H, W)


if __name__ == "__main__":
    B, C, H, W = 2, 4, 16, 16           # spatial_dim = 256, divisible by num_heads=8
    HW = H * W
    num_heads = 8

    key = jax.random.PRNGKey(0)
    ks = jax.random.split(key, 10)
    x_q = jax.random.normal(ks[0], (B, C, H, W), jnp.float32)
    y_kv = jax.random.normal(ks[1], (B, C, H, W), jnp.float32)

    params = {
        "conv_w": jax.random.normal(ks[2], (C,), jnp.float32) * 0.5,       # Conv2d(C,1,1) weight
        "conv_b": jax.random.normal(ks[3], (1,), jnp.float32) * 0.1,       # Conv2d bias
        "ln_w": 1.0 + 0.1 * jax.random.normal(ks[4], (HW,), jnp.float32),  # norm1 gamma
        "ln_b": 0.1 * jax.random.normal(ks[5], (HW,), jnp.float32),        # norm1 beta
        "q_w": jax.random.normal(ks[6], (HW, HW), jnp.float32) * 0.05,     # Linear(dim,dim), no bias
        "kv_w": jax.random.normal(ks[7], (2 * HW, HW), jnp.float32) * 0.05,  # Linear(dim,2dim), no bias
        "proj_w": jax.random.normal(ks[8], (HW, HW), jnp.float32) * 0.05,  # Linear(dim,dim)
        "proj_b": jax.random.normal(ks[9], (HW,), jnp.float32) * 0.1,
    }

    out = jax.block_until_ready(channel_block_forward(x_q, y_kv, params, num_heads=num_heads))
    ref = jax.block_until_ready(reference_forward(x_q, y_kv, params, num_heads=num_heads))

    assert out.shape == (B, C, H, W)
    # Tolerance reflects the bf16 weight path (q/kv/proj weights + matmul operands in bf16 on
    # the MXU, f32 accumulation) against an all-f32 XLA reference; an all-f32 kernel variant
    # matches to ~1e-4.  The kernel's dropped conv bias is exact (cancels under LayerNorm) and
    # the reference keeps it, so this also cross-checks that simplification.
    np.testing.assert_allclose(np.asarray(out), np.asarray(ref), rtol=3e-2, atol=3e-2)

    print("KERNEL_OK")
</pallas_src>

<mosaic_0001>
module attributes {stable_mosaic.version = 11 : i64} {
  func.func @_channel_block_kernel(%arg0: i32, %arg1: memref<8x256xf32, #tpu.memory_space<vmem>>, %arg2: memref<8x256xf32, #tpu.memory_space<vmem>>, %arg3: memref<2x8xf32, #tpu.memory_space<vmem>>, %arg4: memref<1x256xf32, #tpu.memory_space<vmem>>, %arg5: memref<1x256xf32, #tpu.memory_space<vmem>>, %arg6: memref<256x256xbf16, #tpu.memory_space<vmem>>, %arg7: memref<256x512xbf16, #tpu.memory_space<vmem>>, %arg8: memref<8x2xf32, #tpu.memory_space<vmem>>, %arg9: memref<256x8xf32, #tpu.memory_space<vmem>>, %arg10: memref<8x256xf32, #tpu.memory_space<vmem>>, %arg11: memref<2x8xf32, #tpu.memory_space<vmem>>, %arg12: memref<8x8xf32, #tpu.memory_space<vmem>>, %arg13: memref<256x256xbf16, #tpu.memory_space<vmem>>, %arg14: memref<1x256xf32, #tpu.memory_space<vmem>>, %arg15: memref<8x256xf32, #tpu.memory_space<vmem>>) attributes {dimension_semantics = [#tpu.dimension_semantics<arbitrary>], iteration_bounds = array<i64: 1>, scalar_prefetch = 0 : i64, scratch_operands = 0 : i64, tpu.core_type = #tpu.core_type<tc>, window_params = [{pipeline_mode = #tpu.pipeline_mode<synchronous>, transform_indices = @transform_0, window_bounds = array<i64: 8, 256>}, {pipeline_mode = #tpu.pipeline_mode<synchronous>, transform_indices = @transform_1, window_bounds = array<i64: 8, 256>}, {pipeline_mode = #tpu.pipeline_mode<synchronous>, transform_indices = @transform_2, window_bounds = array<i64: 2, 8>}, {pipeline_mode = #tpu.pipeline_mode<synchronous>, transform_indices = @transform_3, window_bounds = array<i64: 1, 256>}, {pipeline_mode = #tpu.pipeline_mode<synchronous>, transform_indices = @transform_4, window_bounds = array<i64: 1, 256>}, {pipeline_mode = #tpu.pipeline_mode<synchronous>, transform_indices = @transform_5, window_bounds = array<i64: 256, 256>}, {pipeline_mode = #tpu.pipeline_mode<synchronous>, transform_indices = @transform_6, window_bounds = array<i64: 256, 512>}, {pipeline_mode = #tpu.pipeline_mode<synchronous>, transform_indices = @transform_7, window_bounds = array<i64: 8, 2>}, {pipeline_mode = #tpu.pipeline_mode<synchronous>, transform_indices = @transform_8, window_bounds = array<i64: 256, 8>}, {pipeline_mode = #tpu.pipeline_mode<synchronous>, transform_indices = @transform_9, window_bounds = array<i64: 8, 256>}, {pipeline_mode = #tpu.pipeline_mode<synchronous>, transform_indices = @transform_10, window_bounds = array<i64: 2, 8>}, {pipeline_mode = #tpu.pipeline_mode<synchronous>, transform_indices = @transform_11, window_bounds = array<i64: 8, 8>}, {pipeline_mode = #tpu.pipeline_mode<synchronous>, transform_indices = @transform_12, window_bounds = array<i64: 256, 256>}, {pipeline_mode = #tpu.pipeline_mode<synchronous>, transform_indices = @transform_13, window_bounds = array<i64: 1, 256>}, {pipeline_mode = #tpu.pipeline_mode<synchronous>, transform_indices = @transform_14, window_bounds = array<i64: 8, 256>}]} {
    %c0 = arith.constant 0 : index
    %c0_0 = arith.constant 0 : index
    %0 = vector.load %arg1[%c0, %c0_0] : memref<8x256xf32, #tpu.memory_space<vmem>>, vector<8x256xf32>
    %c0_1 = arith.constant 0 : index
    %c0_2 = arith.constant 0 : index
    %1 = vector.load %arg2[%c0_1, %c0_2] : memref<8x256xf32, #tpu.memory_space<vmem>>, vector<8x256xf32>
    %c0_3 = arith.constant 0 : index
    %c0_4 = arith.constant 0 : index
    %2 = vector.load %arg3[%c0_3, %c0_4] : memref<2x8xf32, #tpu.memory_space<vmem>>, vector<2x8xf32>
    %cst = arith.constant dense<0.000000e+00> : vector<2x256xf32>
    %3 = tpu.matmul %2, %0, %cst {dimension_numbers = #tpu.dot_dimension_numbers<[1], [0], [0], [1], [0, 0, 1, 1], [], []>} : vector<2x8xf32>, vector<8x256xf32>, vector<2x256xf32> -> vector<2x256xf32>
    %c0_5 = arith.constant 0 : index
    %c0_6 = arith.constant 0 : index
    %4 = vector.load %arg4[%c0_5, %c0_6] : memref<1x256xf32, #tpu.memory_space<vmem>>, vector<1x256xf32>
    %c0_7 = arith.constant 0 : index
    %c0_8 = arith.constant 0 : index
    %5 = vector.load %arg5[%c0_7, %c0_8] : memref<1x256xf32, #tpu.memory_space<vmem>>, vector<1x256xf32>
    %cst_9 = arith.constant dense<0.000000e+00> : vector<2xf32>
    %6 = vector.multi_reduction <add>, %3, %cst_9 [1] : vector<2x256xf32> to vector<2xf32>
    %7 = vector.shape_cast %6 : vector<2xf32> to vector<2x1xf32>
    %cst_10 = arith.constant 2.560000e+02 : f32
    %8 = vector.broadcast %cst_10 : f32 to vector<2x1xf32>
    %9 = arith.divf %7, %8 : vector<2x1xf32>
    %10 = vector.broadcast %9 : vector<2x1xf32> to vector<2x256xf32>
    %11 = arith.subf %3, %10 : vector<2x256xf32>
    %12 = arith.mulf %11, %11 : vector<2x256xf32>
    %cst_11 = arith.constant dense<0.000000e+00> : vector<2xf32>
    %13 = vector.multi_reduction <add>, %12, %cst_11 [1] : vector<2x256xf32> to vector<2xf32>
    %14 = vector.shape_cast %13 : vector<2xf32> to vector<2x1xf32>
    %cst_12 = arith.constant 2.560000e+02 : f32
    %15 = vector.broadcast %cst_12 : f32 to vector<2x1xf32>
    %16 = arith.divf %14, %15 : vector<2x1xf32>
    %17 = vector.broadcast %9 : vector<2x1xf32> to vector<2x256xf32>
    %18 = arith.subf %3, %17 : vector<2x256xf32>
    %cst_13 = arith.constant 9.99999974E-6 : f32
    %19 = vector.broadcast %cst_13 : f32 to vector<2x1xf32>
    %20 = arith.addf %16, %19 : vector<2x1xf32>
    %21 = math.rsqrt %20 : vector<2x1xf32>
    %22 = vector.broadcast %21 : vector<2x1xf32> to vector<2x256xf32>
    %23 = arith.mulf %18, %22 : vector<2x256xf32>
    %24 = vector.broadcast %4 : vector<1x256xf32> to vector<2x256xf32>
    %25 = arith.mulf %23, %24 : vector<2x256xf32>
    %26 = vector.broadcast %5 : vector<1x256xf32> to vector<2x256xf32>
    %27 = arith.addf %25, %26 : vector<2x256xf32>
    %cst_14 = arith.constant dense<0.000000e+00> : vector<8xf32>
    %28 = vector.multi_reduction <add>, %1, %cst_14 [1] : vector<8x256xf32> to vector<8xf32>
    %29 = vector.shape_cast %28 : vector<8xf32> to vector<8x1xf32>
    %cst_15 = arith.constant 2.560000e+02 : f32
    %30 = vector.broadcast %cst_15 : f32 to vector<8x1xf32>
    %31 = arith.divf %29, %30 : vector<8x1xf32>
    %32 = vector.broadcast %31 : vector<8x1xf32> to vector<8x256xf32>
    %33 = arith.subf %1, %32 : vector<8x256xf32>
    %34 = arith.mulf %33, %33 : vector<8x256xf32>
    %cst_16 = arith.constant dense<0.000000e+00> : vector<8xf32>
    %35 = vector.multi_reduction <add>, %34, %cst_16 [1] : vector<8x256xf32> to vector<8xf32>
    %36 = vector.shape_cast %35 : vector<8xf32> to vector<8x1xf32>
    %cst_17 = arith.constant 2.560000e+02 : f32
    %37 = vector.broadcast %cst_17 : f32 to vector<8x1xf32>
    %38 = arith.divf %36, %37 : vector<8x1xf32>
    %39 = vector.broadcast %31 : vector<8x1xf32> to vector<8x256xf32>
    %40 = arith.subf %1, %39 : vector<8x256xf32>
    %cst_18 = arith.constant 9.99999974E-6 : f32
    %41 = vector.broadcast %cst_18 : f32 to vector<8x1xf32>
    %42 = arith.addf %38, %41 : vector<8x1xf32>
    %43 = math.rsqrt %42 : vector<8x1xf32>
    %44 = vector.broadcast %43 : vector<8x1xf32> to vector<8x256xf32>
    %45 = arith.mulf %40, %44 : vector<8x256xf32>
    %46 = vector.broadcast %4 : vector<1x256xf32> to vector<8x256xf32>
    %47 = arith.mulf %45, %46 : vector<8x256xf32>
    %48 = vector.broadcast %5 : vector<1x256xf32> to vector<8x256xf32>
    %49 = arith.addf %47, %48 : vector<8x256xf32>
    %50 = arith.truncf %27 : vector<2x256xf32> to vector<2x256xbf16>
    %c0_19 = arith.constant 0 : index
    %c0_20 = arith.constant 0 : index
    %51 = vector.load %arg6[%c0_19, %c0_20] : memref<256x256xbf16, #tpu.memory_space<vmem>>, vector<256x256xbf16>
    %cst_21 = arith.constant dense<0.000000e+00> : vector<2x256xf32>
    %52 = tpu.matmul %50, %51, %cst_21 {dimension_numbers = #tpu.dot_dimension_numbers<[1], [0], [0], [1], [0, 0, 1, 1], [], []>} : vector<2x256xbf16>, vector<256x256xbf16>, vector<2x256xf32> -> vector<2x256xf32>
    %53 = arith.truncf %49 : vector<8x256xf32> to vector<8x256xbf16>
    %c0_22 = arith.constant 0 : index
    %c0_23 = arith.constant 0 : index
    %54 = vector.load %arg7[%c0_22, %c0_23] : memref<256x512xbf16, #tpu.memory_space<vmem>>, vector<256x512xbf16>
    %cst_24 = arith.constant dense<0.000000e+00> : vector<8x512xf32>
    %55 = tpu.matmul %53, %54, %cst_24 {dimension_numbers = #tpu.dot_dimension_numbers<[1], [0], [0], [1], [0, 0, 1, 1], [], []>} : vector<8x256xbf16>, vector<256x512xbf16>, vector<8x512xf32> -> vector<8x512xf32>
    %56 = vector.extract_strided_slice %55 {offsets = [0, 0], sizes = [8, 256], strides = [1, 1]} : vector<8x512xf32> to vector<8x256xf32>
    %57 = vector.extract_strided_slice %55 {offsets = [0, 256], sizes = [8, 256], strides = [1, 1]} : vector<8x512xf32> to vector<8x256xf32>
    %c0_25 = arith.constant 0 : index
    %c0_26 = arith.constant 0 : index
    %58 = vector.load %arg8[%c0_25, %c0_26] : memref<8x2xf32, #tpu.memory_space<vmem>>, vector<8x2xf32>
    %cst_27 = arith.constant dense<0.000000e+00> : vector<8x256xf32>
    %59 = tpu.matmul %58, %52, %cst_27 {dimension_numbers = #tpu.dot_dimension_numbers<[1], [0], [0], [1], [0, 0, 1, 1], [], []>} : vector<8x2xf32>, vector<2x256xf32>, vector<8x256xf32> -> vector<8x256xf32>
    %60 = arith.mulf %59, %56 : vector<8x256xf32>
    %c0_28 = arith.constant 0 : index
    %c0_29 = arith.constant 0 : index
    %61 = vector.load %arg9[%c0_28, %c0_29] : memref<256x8xf32, #tpu.memory_space<vmem>>, vector<256x8xf32>
    %cst_30 = arith.constant dense<0.000000e+00> : vector<8x8xf32>
    %62 = tpu.matmul %60, %61, %cst_30 {dimension_numbers = #tpu.dot_dimension_numbers<[1], [0], [0], [1], [0, 0, 1, 1], [], []>} : vector<8x256xf32>, vector<256x8xf32>, vector<8x8xf32> -> vector<8x8xf32>
    %cst_31 = arith.constant 0.176776692 : f32
    %63 = vector.broadcast %cst_31 : f32 to vector<8x8xf32>
    %64 = arith.mulf %62, %63 : vector<8x8xf32>
    %cst_32 = arith.constant dense<0xFF800000> : vector<8xf32>
    %65 = vector.multi_reduction <maximumf>, %64, %cst_32 [0] : vector<8x8xf32> to vector<8xf32>
    %66 = vector.shape_cast %65 : vector<8xf32> to vector<1x8xf32>
    %67 = vector.broadcast %66 : vector<1x8xf32> to vector<8x8xf32>
    %68 = arith.subf %64, %67 : vector<8x8xf32>
    %69 = math.exp %68 : vector<8x8xf32>
    %c0_33 = arith.constant 0 : index
    %c0_34 = arith.constant 0 : index
    %70 = vector.load %arg12[%c0_33, %c0_34] : memref<8x8xf32, #tpu.memory_space<vmem>>, vector<8x8xf32>
    %cst_35 = arith.constant dense<0.000000e+00> : vector<8x8xf32>
    %71 = tpu.matmul %70, %69, %cst_35 {dimension_numbers = #tpu.dot_dimension_numbers<[1], [0], [0], [1], [0, 0, 1, 1], [], []>} : vector<8x8xf32>, vector<8x8xf32>, vector<8x8xf32> -> vector<8x8xf32>
    %72 = arith.divf %69, %71 : vector<8x8xf32>
    %c0_36 = arith.constant 0 : index
    %c0_37 = arith.constant 0 : index
    %73 = vector.load %arg10[%c0_36, %c0_37] : memref<8x256xf32, #tpu.memory_space<vmem>>, vector<8x256xf32>
    %cst_38 = arith.constant dense<0.000000e+00> : vector<8x256xf32>
    %74 = tpu.matmul %72, %73, %cst_38 {dimension_numbers = #tpu.dot_dimension_numbers<[1], [0], [0], [1], [0, 0, 1, 1], [], []>} : vector<8x8xf32>, vector<8x256xf32>, vector<8x256xf32> -> vector<8x256xf32>
    %c0_39 = arith.constant 0 : index
    %c0_40 = arith.constant 0 : index
    %75 = vector.load %arg11[%c0_39, %c0_40] : memref<2x8xf32, #tpu.memory_space<vmem>>, vector<2x8xf32>
    %76 = arith.mulf %74, %57 : vector<8x256xf32>
    %cst_41 = arith.constant dense<0.000000e+00> : vector<2x256xf32>
    %77 = tpu.matmul %75, %76, %cst_41 {dimension_numbers = #tpu.dot_dimension_numbers<[1], [0], [0], [1], [0, 0, 1, 1], [], []>} : vector<2x8xf32>, vector<8x256xf32>, vector<2x256xf32> -> vector<2x256xf32>
    %78 = vector.extract_strided_slice %77 {offsets = [0, 0], sizes = [1, 128], strides = [1, 1]} : vector<2x256xf32> to vector<1x128xf32>
    %79 = vector.extract_strided_slice %77 {offsets = [1, 0], sizes = [1, 128], strides = [1, 1]} : vector<2x256xf32> to vector<1x128xf32>
    %80 = tpu.concatenate %78, %79 in 1 : vector<1x128xf32>, vector<1x128xf32> -> vector<1x256xf32>
    %81 = vector.extract_strided_slice %77 {offsets = [0, 128], sizes = [1, 128], strides = [1, 1]} : vector<2x256xf32> to vector<1x128xf32>
    %82 = vector.extract_strided_slice %77 {offsets = [1, 128], sizes = [1, 128], strides = [1, 1]} : vector<2x256xf32> to vector<1x128xf32>
    %83 = tpu.concatenate %81, %82 in 1 : vector<1x128xf32>, vector<1x128xf32> -> vector<1x256xf32>
    %84 = tpu.concatenate %80, %83 in 0 : vector<1x256xf32>, vector<1x256xf32> -> vector<2x256xf32>
    %85 = arith.truncf %84 : vector<2x256xf32> to vector<2x256xbf16>
    %c0_42 = arith.constant 0 : index
    %c0_43 = arith.constant 0 : index
    %86 = vector.load %arg13[%c0_42, %c0_43] : memref<256x256xbf16, #tpu.memory_space<vmem>>, vector<256x256xbf16>
    %cst_44 = arith.constant dense<0.000000e+00> : vector<2x256xf32>
    %87 = tpu.matmul %85, %86, %cst_44 {dimension_numbers = #tpu.dot_dimension_numbers<[1], [0], [0], [1], [0, 0, 1, 1], [], []>} : vector<2x256xbf16>, vector<256x256xbf16>, vector<2x256xf32> -> vector<2x256xf32>
    %c0_45 = arith.constant 0 : index
    %c0_46 = arith.constant 0 : index
    %88 = vector.load %arg14[%c0_45, %c0_46] : memref<1x256xf32, #tpu.memory_space<vmem>>, vector<1x256xf32>
    %89 = vector.broadcast %88 : vector<1x256xf32> to vector<2x256xf32>
    %90 = arith.addf %87, %89 : vector<2x256xf32>
    %c0_47 = arith.constant 0 : index
    %c0_48 = arith.constant 0 : index
    %91 = vector.load %arg8[%c0_47, %c0_48] : memref<8x2xf32, #tpu.memory_space<vmem>>, vector<8x2xf32>
    %cst_49 = arith.constant dense<0.000000e+00> : vector<8x256xf32>
    %92 = tpu.matmul %91, %90, %cst_49 {dimension_numbers = #tpu.dot_dimension_numbers<[1], [0], [0], [1], [0, 0, 1, 1], [], []>} : vector<8x2xf32>, vector<2x256xf32>, vector<8x256xf32> -> vector<8x256xf32>
    %93 = arith.mulf %92, %1 : vector<8x256xf32>
    %c0_50 = arith.constant 0 : index
    %c0_51 = arith.constant 0 : index
    %94 = vector.load %arg15[%c0_50, %c0_51] : memref<8x256xf32, #tpu.memory_space<vmem>>, vector<8x256xf32>
    tpu.vector_store %arg15[%c0_50, %c0_51], %93 {strides = array<i32>} : memref<8x256xf32, #tpu.memory_space<vmem>>, vector<8x256xf32>,
    return
  }
  func.func @transform_0(%arg0: i32) -> (i32, i32) {
    %c0_i32 = arith.constant 0 : i32
    %c0_i32_0 = arith.constant 0 : i32
    %c0_i32_1 = arith.constant 0 : i32
    return %c0_i32, %c0_i32_0 : i32, i32
  }
  func.func @transform_1(%arg0: i32) -> (i32, i32) {
    %c0_i32 = arith.constant 0 : i32
    %c0_i32_0 = arith.constant 0 : i32
    %c0_i32_1 = arith.constant 0 : i32
    return %c0_i32, %c0_i32_0 : i32, i32
  }
  func.func @transform_2(%arg0: i32) -> (i32, i32) {
    %c0_i32 = arith.constant 0 : i32
    %c0_i32_0 = arith.constant 0 : i32
    %c0_i32_1 = arith.constant 0 : i32
    return %c0_i32, %c0_i32_0 : i32, i32
  }
  func.func @transform_3(%arg0: i32) -> (i32, i32) {
    %c0_i32 = arith.constant 0 : i32
    %c0_i32_0 = arith.constant 0 : i32
    %c0_i32_1 = arith.constant 0 : i32
    return %c0_i32, %c0_i32_0 : i32, i32
  }
  func.func @transform_4(%arg0: i32) -> (i32, i32) {
    %c0_i32 = arith.constant 0 : i32
    %c0_i32_0 = arith.constant 0 : i32
    %c0_i32_1 = arith.constant 0 : i32
    return %c0_i32, %c0_i32_0 : i32, i32
  }
  func.func @transform_5(%arg0: i32) -> (i32, i32) {
    %c0_i32 = arith.constant 0 : i32
    %c0_i32_0 = arith.constant 0 : i32
    %c0_i32_1 = arith.constant 0 : i32
    return %c0_i32, %c0_i32_0 : i32, i32
  }
  func.func @transform_6(%arg0: i32) -> (i32, i32) {
    %c0_i32 = arith.constant 0 : i32
    %c0_i32_0 = arith.constant 0 : i32
    %c0_i32_1 = arith.constant 0 : i32
    return %c0_i32, %c0_i32_0 : i32, i32
  }
  func.func @transform_7(%arg0: i32) -> (i32, i32) {
    %c0_i32 = arith.constant 0 : i32
    %c0_i32_0 = arith.constant 0 : i32
    %c0_i32_1 = arith.constant 0 : i32
    return %c0_i32, %c0_i32_0 : i32, i32
  }
  func.func @transform_8(%arg0: i32) -> (i32, i32) {
    %c0_i32 = arith.constant 0 : i32
    %c0_i32_0 = arith.constant 0 : i32
    %c0_i32_1 = arith.constant 0 : i32
    return %c0_i32, %c0_i32_0 : i32, i32
  }
  func.func @transform_9(%arg0: i32) -> (i32, i32) {
    %c0_i32 = arith.constant 0 : i32
    %c0_i32_0 = arith.constant 0 : i32
    %c0_i32_1 = arith.constant 0 : i32
    return %c0_i32, %c0_i32_0 : i32, i32
  }
  func.func @transform_10(%arg0: i32) -> (i32, i32) {
    %c0_i32 = arith.constant 0 : i32
    %c0_i32_0 = arith.constant 0 : i32
    %c0_i32_1 = arith.constant 0 : i32
    return %c0_i32, %c0_i32_0 : i32, i32
  }
  func.func @transform_11(%arg0: i32) -> (i32, i32) {
    %c0_i32 = arith.constant 0 : i32
    %c0_i32_0 = arith.constant 0 : i32
    %c0_i32_1 = arith.constant 0 : i32
    return %c0_i32, %c0_i32_0 : i32, i32
  }
  func.func @transform_12(%arg0: i32) -> (i32, i32) {
    %c0_i32 = arith.constant 0 : i32
    %c0_i32_0 = arith.constant 0 : i32
    %c0_i32_1 = arith.constant 0 : i32
    return %c0_i32, %c0_i32_0 : i32, i32
  }
  func.func @transform_13(%arg0: i32) -> (i32, i32) {
    %c0_i32 = arith.constant 0 : i32
    %c0_i32_0 = arith.constant 0 : i32
    %c0_i32_1 = arith.constant 0 : i32
    return %c0_i32, %c0_i32_0 : i32, i32
  }
  func.func @transform_14(%arg0: i32) -> (i32, i32) {
    %c0_i32 = arith.constant 0 : i32
    %c0_i32_0 = arith.constant 0 : i32
    %c0_i32_1 = arith.constant 0 : i32
    return %c0_i32, %c0_i32_0 : i32, i32
  }
}

</mosaic_0001>

<bundles_post_ra>
// kernel: tile.8
= control target key start
LH: loop header
LB: loop body
LE: loop exit
PB: predicated region body
PF: predicated region fallthrough
CT: control target
= control target key end

     0   :  { %s22_s0 = inlined_call_operand.vmem [shape: f32[4], index: 0, kind: input, shape index: {}]   ;;  %s23_s1 = inlined_call_operand.vmem [shape: f32[2,4], index: 1, kind: output, shape index: {}]  }
   0x1   :  { %v4_v0 = vld [vmem:[%s22_s0] ss:$0 sm:$0xff] }
   0x2   :  { %5 = vst [vmem:[%s23_s1] sm:$0x3] %v4_v0 }

// kernel: mul.5
= control target key start
LH: loop header
LB: loop body
LE: loop exit
PB: predicated region body
PF: predicated region fallthrough
CT: control target
= control target key end

     0   :  { %vm7_vm0 = vcmask 31744   ;;  %vm13_vm1 = vcmask 64544   ;;  %s39_s0 = inlined_call_operand.vmem [shape: f32[2,4], index: 0, kind: input, shape index: {}]   ;;  %s40_s1 = inlined_call_operand.vmem [shape: f32[8], index: 1, kind: output, shape index: {}]  }
   0x1   :  { %v4_v0 = vld [vmem:[%s39_s0] sm:$0x3]  ;;  %s22_s0 = smov 4  }
   0x2   :  { %5 = vst [vmem:[#allocation1] sm:$0x3] %v4_v0 }
   0x9   :  { %v10_v1 = vld [vmem:[#allocation1 + $0x1] sm:$0x1]   ;;  %v6_v2 = vld [vmem:[#allocation1] sm:$0x1]  }
   0xa   :  { %11 = vrot.lane.b32.xlu0 %v10_v1, %s22_s0  ;;  %8 = vst.msk [vmem:[#allocation0] sm:$0x1] %vm7_vm0, %v6_v2  }
  0x7c   :  { %v12_v3 = vpop.permute.xlu0 %11  }
  0x7d   :  { %14 = vst.msk [vmem:[#allocation0] sm:$0x1] %vm13_vm1, %v12_v3  }
  0x84   :  { %v18_v4 = vld [vmem:[#allocation0] sm:$0x1] }
  0x85   :  { %20 = vst [vmem:[%s40_s1] sm:$0x1] %v18_v4 }

// kernel: channel_block_forward.1
= control target key start
LH: loop header
LB: loop body
LE: loop exit
PB: predicated region body
PF: predicated region fallthrough
CT: control target
= control target key end

     0   :  { %v2087_v2 = vmov 0.0   ;;  %vm52_vm0 = vcmask 64512   ;;  %vm129_vm1 = vcmask 1041408   ;;  %vm901_vm2 = vcmask 15360   ;;  %s2761_s0 = inlined_call_operand.vmem [shape: f32[8,256], index: 0, kind: input, shape index: {}]   ;;  %s2762_s2 = inlined_call_operand.vmem [shape: f32[2,8], index: 2, kind: input, shape index: {}]   ;;  %s2763_s1 = inlined_call_operand.vmem [shape: f32[8,256], index: 1, kind: input, shape index: {}]   ;;  %s2764_s5 = inlined_call_operand.vmem [shape: bf16[256,256], index: 5, kind: input, shape index: {}]   ;;  %s2765_s6 = inlined_call_operand.vmem [shape: bf16[256,512], index: 6, kind: input, shape index: {}]   ;;  %s2766_s3 = inlined_call_operand.vmem [shape: f32[1,256], index: 3, kind: input, shape index: {}]   ;;  %s2767_s4 = inlined_call_operand.vmem [shape: f32[1,256], index: 4, kind: input, shape index: {}]   ;;  %s2768_s8 = inlined_call_operand.vmem [shape: f32[256,8], index: 8, kind: input, shape index: {}]   ;;  %s2769_s7 = inlined_call_operand.vmem [shape: f32[8,2], index: 7, kind: input, shape index: {}]   ;;  %s2770_s11 = inlined_call_operand.vmem [shape: f32[8,8], index: 11, kind: input, shape index: {}]   ;;  %s2771_s9 = inlined_call_operand.vmem [shape: f32[8,256], index: 9, kind: input, shape index: {}]   ;;  %s2772_s12 = inlined_call_operand.vmem [shape: bf16[256,256], index: 12, kind: input, shape index: {}]   ;;  %s2773_s10 = inlined_call_operand.vmem [shape: f32[2,8], index: 10, kind: input, shape index: {}]   ;;  %s2774_s13 = inlined_call_operand.vmem [shape: f32[1,256], index: 13, kind: input, shape index: {}]   ;;  %s2775_s14 = inlined_call_operand.vmem [shape: f32[8,256], index: 14, kind: output, shape index: {}]  }
   0x1   :  { %v48_v0 = vld [vmem:[%s2761_s0 + $0x8] sm:$0xff]  ;;  %v47_v1 = vld [vmem:[%s2761_s0] sm:$0xff]  ;;  %120 = vmatprep.mubr.f32.mxu0 %v2087_v2  ;;  %v1888_v18 = vld [vmem:[%s2764_s5 + $0x14] ss:$8 sps:$4 sm:$0xff]   ;;  %vm2088_vm3 = vmmov 0   ;;  %vm1335_vm4 = vcmask 1040384  }
   0x2   :  { %v51_v3 = vld [vmem:[%s2762_s2] sm:$0x3]  ;;  %56 = vmatprep.subr.mxu0 %v48_v0  ;;  %v50_v5 = vld [vmem:[%s2763_s1 + $0x8] sm:$0xff]  ;;  %v1890_v19 = vld [vmem:[%s2764_s5 + $0x10] ss:$8 sps:$4 sm:$0xff]  }
   0x3   :  { %57 = vmatpush1.msra.mxu0 %v47_v1  ;;  %v49_v4 = vld [vmem:[%s2763_s1] sm:$0xff]  ;;  %v1894_v25 = vld [vmem:[%s2764_s5 + $0x34] ss:$8 sps:$4 sm:$0xff]   ;;  %v1896_v26 = vld [vmem:[%s2764_s5 + $0x30] ss:$8 sps:$4 sm:$0xff]  }
   0x4   :  { %1670 = vmatmul.mubr.msk.f32.vlgmr.msra.gmra.mrb[0].mxu0 %vm52_vm0, %v51_v3  ;;  %v177_v6 = vadd.f32 %v50_v5, %v49_v4  ;;  %v1885_v14 = vld [vmem:[%s2764_s5 + $0x4] ss:$8 sps:$4 sm:$0xff]   ;;  %v1887_v15 = vld [vmem:[%s2764_s5] ss:$8 sps:$4 sm:$0xff]   ;;  %v1900_v29 = vld [vmem:[%s2764_s5 + $0x54] ss:$8 sps:$4 sm:$0xff]  }
   0x5   :  { %391 = vmatprep.subr.bf16.mxu1 %v1885_v14  ;;  %v1891_v22 = vld [vmem:[%s2764_s5 + $0x24] ss:$8 sps:$4 sm:$0xff]   ;;  %v1893_v24 = vld [vmem:[%s2764_s5 + $0x20] ss:$8 sps:$4 sm:$0xff]   ;;  %v1902_v30 = vld [vmem:[%s2764_s5 + $0x50] ss:$8 sps:$4 sm:$0xff]  }
   0x6   :  { %178 = vadd.xlane.f32.xlu1 %v177_v6  ;;  %392 = vmatpush1.bf16.msra.mxu1 %v1887_v15  ;;  %v1897_v27 = vld [vmem:[%s2764_s5 + $0x44] ss:$8 sps:$4 sm:$0xff]   ;;  %v1899_v28 = vld [vmem:[%s2764_s5 + $0x40] ss:$8 sps:$4 sm:$0xff]   ;;  %v1906_v33 = vld [vmem:[%s2764_s5 + $0x74] ss:$8 sps:$4 sm:$0xff]  }
   0x7   :  { %393 = vmatprep.subr.bf16.mxu1 %v1888_v18  ;;  %v1903_v31 = vld [vmem:[%s2764_s5 + $0x64] ss:$8 sps:$4 sm:$0xff]   ;;  %v1905_v32 = vld [vmem:[%s2764_s5 + $0x60] ss:$8 sps:$4 sm:$0xff]   ;;  %v1908_v34 = vld [vmem:[%s2764_s5 + $0x70] ss:$8 sps:$4 sm:$0xff]  }
   0x8   :  { %v1909_v35 = vld [vmem:[%s2764_s5 + $0x84] ss:$8 sps:$4 sm:$0xff]   ;;  %v1911_v36 = vld [vmem:[%s2764_s5 + $0x80] ss:$8 sps:$4 sm:$0xff]   ;;  %v1912_v37 = vld [vmem:[%s2764_s5 + $0x94] ss:$8 sps:$4 sm:$0xff]  }
   0x9   :  { %v1914_v38 = vld [vmem:[%s2764_s5 + $0x90] ss:$8 sps:$4 sm:$0xff]   ;;  %v1915_v39 = vld [vmem:[%s2764_s5 + $0xa4] ss:$8 sps:$4 sm:$0xff]   ;;  %v1917_v49 = vld [vmem:[%s2764_s5 + $0xa0] ss:$8 sps:$4 sm:$0xff]  }
   0xa   :  { %394 = vmatpush1.bf16.msra.mxu1 %v1890_v19  ;;  %v1920_v50 = vld [vmem:[%s2765_s6 + $0x4] ss:$16 sps:$4 sm:$0xff]   ;;  %v1918_v51 = vld [vmem:[%s2765_s6] ss:$16 sps:$4 sm:$0xff]  }
   0xb   :  { %395 = vmatprep.subr.bf16.mxu1 %v1891_v22  ;;  %v1921_v52 = vld [vmem:[%s2764_s5 + $0xb4] ss:$8 sps:$4 sm:$0xff]   ;;  %818 = vmatprep.subr.bf16.mxu0 %v1920_v50  ;;  %v1923_v53 = vld [vmem:[%s2764_s5 + $0xb0] ss:$8 sps:$4 sm:$0xff]   ;;  %v1927_v56 = vld [vmem:[%s2764_s5 + $0xc4] ss:$8 sps:$4 sm:$0xff]  }
   0xc   :  { %819 = vmatpush1.bf16.msra.mxu0 %v1918_v51  ;;  %v1924_v54 = vld [vmem:[%s2765_s6 + $0x20] ss:$16 sps:$4 sm:$0xff]   ;;  %v1926_v55 = vld [vmem:[%s2765_s6 + $0x24] ss:$16 sps:$4 sm:$0xff]  }
   0xd   :  { %v1929_v57 = vld [vmem:[%s2764_s5 + $0xc0] ss:$8 sps:$4 sm:$0xff]   ;;  %v1932_v58 = vld [vmem:[%s2765_s6 + $0x44] ss:$16 sps:$4 sm:$0xff]   ;;  %820 = vmatprep.subr.bf16.mxu0 %v1926_v55  ;;  %v1935_v61 = vld [vmem:[%s2764_s5 + $0xd0] ss:$8 sps:$4 sm:$0xff]  }
   0xe   :  { %396 = vmatpush1.bf16.msra.mxu1 %v1893_v24  ;;  %v1933_v59 = vld [vmem:[%s2764_s5 + $0xd4] ss:$8 sps:$4 sm:$0xff]   ;;  %v1930_v60 = vld [vmem:[%s2765_s6 + $0x40] ss:$16 sps:$4 sm:$0xff]   ;;  %v1939_v63 = vld [vmem:[%s2764_s5 + $0xe4] ss:$8 sps:$4 sm:$0xff]  }
   0xf   :  { %397 = vmatprep.subr.bf16.mxu1 %v1894_v25  ;;  %v1938_v62 = vld [vmem:[%s2765_s6 + $0x64] ss:$16 sps:$4 sm:$0xff]   ;;  %v1936_v0 = vld [vmem:[%s2765_s6 + $0x60] ss:$16 sps:$4 sm:$0xff]  }
  0x10   :  { %821 = vmatpush1.bf16.msra.mxu0 %v1924_v54  ;;  %v1941_v1 = vld [vmem:[%s2764_s5 + $0xe0] ss:$8 sps:$4 sm:$0xff]   ;;  %v1944_v3 = vld [vmem:[%s2765_s6 + $0x84] ss:$16 sps:$4 sm:$0xff]   ;;  %v1947_v6 = vld [vmem:[%s2764_s5 + $0xf0] ss:$8 sps:$4 sm:$0xff]  }
  0x11   :  { %822 = vmatprep.subr.bf16.mxu0 %v1932_v58  ;;  %v1966_v14 = vld [vmem:[%s2765_s6 + $0x100] ss:$16 sps:$4 sm:$0xff]   ;;  %v1968_v15 = vld [vmem:[%s2765_s6 + $0x104] ss:$16 sps:$4 sm:$0xff]  }
  0x12   :  { %398 = vmatpush1.bf16.msra.mxu1 %v1896_v26  ;;  %v1972_v18 = vld [vmem:[%s2765_s6 + $0x120] ss:$16 sps:$4 sm:$0xff]   ;;  %v1974_v19 = vld [vmem:[%s2765_s6 + $0x124] ss:$16 sps:$4 sm:$0xff]  }
  0x13   :  { %399 = vmatprep.subr.bf16.mxu1 %v1897_v27  ;;  %v1980_v22 = vld [vmem:[%s2765_s6 + $0x144] ss:$16 sps:$4 sm:$0xff]   ;;  %v1984_v25 = vld [vmem:[%s2765_s6 + $0x160] ss:$16 sps:$4 sm:$0xff]   ;;  %v152_v27 = vlaneseq }
  0x14   :  { %823 = vmatpush1.bf16.msra.mxu0 %v1930_v60  ;;  %v1986_v26 = vld [vmem:[%s2765_s6 + $0x164] ss:$16 sps:$4 sm:$0xff]  }
  0x15   :  { %824 = vmatprep.subr.bf16.mxu0 %v1938_v62 }
  0x16   :  { %400 = vmatpush1.bf16.msra.mxu1 %v1899_v28  ;;  %v1990_v28 = vld [vmem:[%s2765_s6 + $0x180] ss:$16 sps:$4 sm:$0xff]  }
  0x17   :  { %401 = vmatprep.subr.bf16.mxu1 %v1900_v29  ;;  %v1992_v29 = vld [vmem:[%s2765_s6 + $0x184] ss:$16 sps:$4 sm:$0xff]  }
  0x18   :  { %825 = vmatpush1.bf16.msra.mxu0 %v1936_v0 }
  0x19   :  { %826 = vmatprep.subr.bf16.mxu0 %v1944_v3 }
  0x1a   :  { %402 = vmatpush1.bf16.msra.mxu1 %v1902_v30  ;;  %v153_v30 = vshrl.u32 %v152_v27, 7  ;;  %v2017_v27 = vld [vmem:[%s2765_s6 + $0x188] ss:$16 sps:$4 sm:$0xff]  }
  0x1b   :  { %403 = vmatprep.subr.bf16.mxu1 %v1903_v31  ;;  %v1996_v31 = vld [vmem:[%s2765_s6 + $0x1a0] ss:$16 sps:$4 sm:$0xff]  }
  0x1e   :  { %404 = vmatpush1.bf16.msra.mxu1 %v1905_v32  ;;  %v1998_v32 = vld [vmem:[%s2765_s6 + $0x1a4] ss:$16 sps:$4 sm:$0xff]  }
  0x1f   :  { %405 = vmatprep.subr.bf16.mxu1 %v1906_v33  ;;  %v2384_v33 = vsub.s32 1, %v153_v30 }
  0x22   :  { %406 = vmatpush1.bf16.msra.mxu1 %v1908_v34  ;;  %v127_v34 = vld [vmem:[%s2766_s3] sm:$0x3] }
  0x23   :  { %407 = vmatprep.subr.bf16.mxu1 %v1909_v35  ;;  %v2389_v35 = vsub.s32 0, %v153_v30  ;;  %v2025_v30 = vld [vmem:[%s2765_s6 + $0x1cc] ss:$16 sps:$4 sm:$0xff]  }
  0x26   :  { %408 = vmatpush1.bf16.msra.mxu1 %v1911_v36 }
  0x27   :  { %409 = vmatprep.subr.bf16.mxu1 %v1912_v37  ;;  %v128_v37 = vld [vmem:[%s2767_s4] sm:$0x3] }
  0x2a   :  { %410 = vmatpush1.bf16.msra.mxu1 %v1914_v38 }
  0x2b   :  { %411 = vmatprep.subr.bf16.mxu1 %v1915_v39  ;;  %v2002_v39 = vld [vmem:[%s2765_s6 + $0x1c0] ss:$16 sps:$4 sm:$0xff]  }
  0x2e   :  { %412 = vmatpush1.bf16.msra.mxu1 %v1917_v49  ;;  %v2010_v49 = vld [vmem:[%s2765_s6 + $0x1e4] ss:$16 sps:$4 sm:$0xff]  }
  0x2f   :  { %413 = vmatprep.subr.bf16.mxu1 %v1921_v52 }
  0x32   :  { %414 = vmatpush1.bf16.msra.mxu1 %v1923_v53 }
  0x33   :  { %415 = vmatprep.subr.bf16.mxu1 %v1927_v56 }
  0x36   :  { %416 = vmatpush1.bf16.msra.mxu1 %v1929_v57 }
  0x37   :  { %417 = vmatprep.subr.bf16.mxu1 %v1933_v59 }
  0x3a   :  { %418 = vmatpush1.bf16.msra.mxu1 %v1935_v61 }
  0x3b   :  { %419 = vmatprep.subr.bf16.mxu1 %v1939_v63 }
  0x3e   :  { %420 = vmatpush1.bf16.msra.mxu1 %v1941_v1  ;;  %v1951_v1 = vld [vmem:[%s2765_s6 + $0x8] ss:$16 sps:$4 sm:$0xff]  }
  0x93   :  { %v179_v12 = vpop.xlane.xlu1 %178 }
  0x94   :  { %v180_v13 = vmul.f32 0.00390625, %v179_v12  ;;  %v1960_v12 = vld [vmem:[%s2765_s6 + $0xe0] ss:$16 sps:$4 sm:$0xff]  }
  0x96   :  { %v2189_v16 = vsub.f32 %v49_v4, %v180_v13  ;;  %v2191_v17 = vsub.f32 %v50_v5, %v180_v13  ;;  %v1945_v4 = vld [vmem:[%s2764_s5 + $0xf4] ss:$8 sps:$4 sm:$0xff]   ;;  %v1942_v5 = vld [vmem:[%s2765_s6 + $0x80] ss:$16 sps:$4 sm:$0xff]  }
  0x97   :  { %421 = vmatprep.subr.bf16.mxu1 %v1945_v4  ;;  %827 = vmatpush1.bf16.msra.mxu0 %v1942_v5  ;;  %v1962_v13 = vld [vmem:[%s2765_s6 + $0xe4] ss:$16 sps:$4 sm:$0xff]   ;;  %v1959_v4 = vld [vmem:[%s2765_s6 + $0x2c] ss:$16 sps:$4 sm:$0xff]   ;;  %v1963_v5 = vld [vmem:[%s2765_s6 + $0x48] ss:$16 sps:$4 sm:$0xff]  }
  0x98   :  { %v183_v20 = vmul.f32 %v2189_v16, %v2189_v16  ;;  %v184_v21 = vmul.f32 %v2191_v17, %v2191_v17  ;;  %422 = vmatpush1.bf16.msra.mxu1 %v1947_v6  ;;  %v1971_v6 = vld [vmem:[%s2765_s6 + $0x6c] ss:$16 sps:$4 sm:$0xff]  }
  0x9a   :  { %v185_v23 = vadd.f32 %v184_v21, %v183_v20  ;;  %v1978_v21 = vld [vmem:[%s2765_s6 + $0x140] ss:$16 sps:$4 sm:$0xff]  }
  0x9c   :  { %186 = vadd.xlane.f32.xlu1 %v185_v23 }
  0xd7   :  { %v122_v7 = vpop.f32.mrb[0].mxu0 }
  0xd8   :  { %v124_v8 = vpop.f32.mrb[1].mxu0  ;;  %v130_v9 = vsel %vm129_vm1, %v122_v7, 0.0 }
  0xd9   :  { %v131_v10 = vsel %vm129_vm1, %v124_v8, 0.0 }
  0xda   :  { %v132_v11 = vadd.f32 %v131_v10, %v130_v9  ;;  %v1953_v9 = vld [vmem:[%s2765_s6 + $0xc] ss:$16 sps:$4 sm:$0xff]   ;;  %v1954_v10 = vld [vmem:[%s2765_s6 + $0xc0] ss:$16 sps:$4 sm:$0xff]  }
  0xdb   :  { %859 = vmatprep.subr.bf16.mxu1 %v1953_v9  ;;  %v1975_v9 = vld [vmem:[%s2765_s6 + $0x88] ss:$16 sps:$4 sm:$0xff]  }
  0xdc   :  { %133 = vadd.xlane.f32.xlu0 %v132_v11  ;;  %v1956_v11 = vld [vmem:[%s2765_s6 + $0xc4] ss:$16 sps:$4 sm:$0xff]  }
 0x129   :  { %v187_v20 = vpop.xlane.xlu1 %186 }
 0x12a   :  { %v188_v23 = vmul.f32 0.00390625, %v187_v20  ;;  %v2007_v20 = vld [vmem:[%s2765_s6 + $0x12c] ss:$16 sps:$4 sm:$0xff]  }
 0x12c   :  { %v189_v24 = vadd.f32 1e-05, %v188_v23  ;;  %v2011_v23 = vld [vmem:[%s2765_s6 + $0x148] ss:$16 sps:$4 sm:$0xff]  }
 0x12e   :  { %2077 = vrsqrt.f32 %v189_v24  ;;  %v2016_v24 = vld [vmem:[%s2765_s6 + $0x16c] ss:$16 sps:$4 sm:$0xff]  }
 0x138   :  { %v2078_v36 = vpop.eup %2077 }
 0x139   :  { %v191_v38 = vmul.f32 %v2078_v36, %v2189_v16  ;;  %v168_v16 = vrot.slane %v128_v37, %v2389_v35 }
 0x169   :  { %v134_v40 = vpop.xlane.xlu0 %133 }
 0x16a   :  { %v136_v41 = vmul.f32 0.00390625, %v134_v40  ;;  %v2004_v40 = vld [vmem:[%s2765_s6 + $0x1c4] ss:$16 sps:$4 sm:$0xff]  }
 0x16c   :  { %v2254_v42 = vsub.f32 %v122_v7, %v136_v41  ;;  %v2256_v43 = vsub.f32 %v124_v8, %v136_v41  ;;  %v1950_v7 = vld [vmem:[%s2765_s6 + $0xa4] ss:$16 sps:$4 sm:$0xff]   ;;  %v1948_v8 = vld [vmem:[%s2765_s6 + $0xa0] ss:$16 sps:$4 sm:$0xff]   ;;  %v159_v41 = vrot.slane %v127_v34, %v2384_v33 }
 0x16d   :  { %828 = vmatprep.subr.bf16.mxu0 %v1950_v7  ;;  %v1969_v7 = vld [vmem:[%s2765_s6 + $0x68] ss:$16 sps:$4 sm:$0xff]  }
 0x16e   :  { %v139_v44 = vmul.f32 %v2254_v42, %v2254_v42  ;;  %v140_v45 = vmul.f32 %v2256_v43, %v2256_v43  ;;  %829 = vmatpush1.bf16.msra.mxu0 %v1948_v8  ;;  %v1977_v8 = vld [vmem:[%s2765_s6 + $0x8c] ss:$16 sps:$4 sm:$0xff]  }
 0x16f   :  { %830 = vmatprep.subr.bf16.mxu0 %v1956_v11  ;;  %v1981_v11 = vld [vmem:[%s2765_s6 + $0xa8] ss:$16 sps:$4 sm:$0xff]  }
 0x170   :  { %v141_v46 = vsel %vm129_vm1, %v139_v44, 0.0  ;;  %v142_v47 = vsel %vm129_vm1, %v140_v45, 0.0  ;;  %v192_v44 = vmul.f32 %v2078_v36, %v2191_v17  ;;  %v155_v45 = vrot.slane %v127_v34, %v2389_v35  ;;  %v2026_v34 = vld [vmem:[%s2765_s6 + $0x1e8] ss:$16 sps:$4 sm:$0xff]  }
 0x171   :  { %v143_v48 = vadd.f32 %v142_v47, %v141_v46  ;;  %v172_v46 = vrot.slane %v128_v37, %v2384_v33 }
 0x172   :  { %831 = vmatpush1.bf16.msra.mxu0 %v1954_v10  ;;  %v194_v47 = vmul.f32 %v192_v44, %v159_v41  ;;  %v193_v50 = vmul.f32 %v191_v38, %v155_v45  ;;  %v1983_v10 = vld [vmem:[%s2765_s6 + $0xac] ss:$16 sps:$4 sm:$0xff]   ;;  %v984_v44 = vld [vmem:[%s2768_s8] sm:$0xff] }
 0x173   :  { %144 = vadd.xlane.f32.xlu0 %v143_v48  ;;  %832 = vmatprep.subr.bf16.mxu0 %v1962_v13  ;;  %v2008_v48 = vld [vmem:[%s2765_s6 + $0x1e0] ss:$16 sps:$4 sm:$0xff]   ;;  %v1987_v13 = vld [vmem:[%s2765_s6 + $0xc8] ss:$16 sps:$4 sm:$0xff]  }
 0x174   :  { %v196_v51 = vadd.f32 %v194_v47, %v172_v46  ;;  %v195_v17 = vadd.f32 %v193_v50, %v168_v16  ;;  %v1002_v47 = vld [vmem:[%s2768_s8 + $0x90] sm:$0xff] }
 0x175   :  { %v986_v50 = vld [vmem:[%s2768_s8 + $0x10] sm:$0xff] }
 0x176   :  { %833 = vmatpush1.bf16.msra.mxu0 %v1960_v12  ;;  %v433_v52 = vpack.c.bf16 %v196_v51, %v196_v51  ;;  %v2412_v53 = vpack.c.bf16 %v195_v17, %v195_v17  ;;  %v1989_v12 = vld [vmem:[%s2765_s6 + $0xcc] ss:$16 sps:$4 sm:$0xff]   ;;  %v1004_v17 = vld [vmem:[%s2768_s8 + $0xa0] sm:$0xff] }
 0x177   :  { %834 = vmatprep.subr.bf16.mxu0 %v1968_v15  ;;  %v1993_v15 = vld [vmem:[%s2765_s6 + $0xe8] ss:$16 sps:$4 sm:$0xff]  }
 0x178   :  { %850 = vmatprep.mubr.bf16.mxu0 %v433_v52  ;;  %v987_v51 = vld [vmem:[%s2768_s8 + $0x18] sm:$0xff] }
 0x17a   :  { %835 = vmatpush1.bf16.msra.mxu0 %v1966_v14  ;;  %v1995_v14 = vld [vmem:[%s2765_s6 + $0xec] ss:$16 sps:$4 sm:$0xff]  }
 0x17b   :  { %836 = vmatprep.subr.bf16.mxu0 %v1974_v19  ;;  %v1999_v19 = vld [vmem:[%s2765_s6 + $0x108] ss:$16 sps:$4 sm:$0xff]  }
 0x17e   :  { %837 = vmatpush1.bf16.msra.mxu0 %v1972_v18  ;;  %v2001_v18 = vld [vmem:[%s2765_s6 + $0x10c] ss:$16 sps:$4 sm:$0xff]  }
 0x17f   :  { %838 = vmatprep.subr.bf16.mxu0 %v1980_v22  ;;  %v2013_v22 = vld [vmem:[%s2765_s6 + $0x14c] ss:$16 sps:$4 sm:$0xff]  }
 0x182   :  { %839 = vmatpush1.bf16.msra.mxu0 %v1978_v21  ;;  %v2005_v21 = vld [vmem:[%s2765_s6 + $0x128] ss:$16 sps:$4 sm:$0xff]  }
 0x183   :  { %840 = vmatprep.subr.bf16.mxu0 %v1986_v26  ;;  %v2019_v26 = vld [vmem:[%s2765_s6 + $0x18c] ss:$16 sps:$4 sm:$0xff]  }
 0x186   :  { %841 = vmatpush1.bf16.msra.mxu0 %v1984_v25  ;;  %v2014_v25 = vld [vmem:[%s2765_s6 + $0x168] ss:$16 sps:$4 sm:$0xff]  }
 0x187   :  { %842 = vmatprep.subr.bf16.mxu0 %v1992_v29  ;;  %v2020_v29 = vld [vmem:[%s2765_s6 + $0x1a8] ss:$16 sps:$4 sm:$0xff]  }
 0x18a   :  { %843 = vmatpush1.bf16.msra.mxu0 %v1990_v28  ;;  %v2022_v28 = vld [vmem:[%s2765_s6 + $0x1ac] ss:$16 sps:$4 sm:$0xff]  }
 0x18b   :  { %844 = vmatprep.subr.bf16.mxu0 %v1998_v32  ;;  %v2028_v32 = vld [vmem:[%s2765_s6 + $0x1ec] ss:$16 sps:$4 sm:$0xff]  }
 0x18e   :  { %845 = vmatpush1.bf16.msra.mxu0 %v1996_v31  ;;  %v2023_v31 = vld [vmem:[%s2765_s6 + $0x1c8] ss:$16 sps:$4 sm:$0xff]  }
 0x18f   :  { %846 = vmatprep.subr.bf16.mxu0 %v2004_v40  ;;  %v1000_v40 = vld [vmem:[%s2768_s8 + $0x80] sm:$0xff] }
 0x192   :  { %847 = vmatpush1.bf16.msra.mxu0 %v2002_v39 }
 0x193   :  { %848 = vmatprep.subr.bf16.mxu0 %v2010_v49 }
 0x196   :  { %849 = vmatpush1.bf16.msra.mxu0 %v2008_v48 }
 0x199   :  { %851 = vmatmul.mubr.bf16.vlgmr.msra.gmra.mrb[4].mxu0 %v2412_v53 }
 0x19a   :  { %975 = vmatprep.mubr.f32.mxu0 %v2087_v2 }
 0x200   :  { %v145_v54 = vpop.xlane.xlu0 %144 }
 0x201   :  { %v146_v55 = vmul.f32 0.00390625, %v145_v54 }
 0x203   :  { %v147_v56 = vadd.f32 1e-05, %v146_v55  ;;  %v988_v55 = vld [vmem:[%s2768_s8 + $0x20] sm:$0xff] }
 0x205   :  { %2079 = vrsqrt.f32 %v147_v56  ;;  %v989_v56 = vld [vmem:[%s2768_s8 + $0x28] sm:$0xff] }
 0x20f   :  { %v2080_v57 = vpop.eup %2079 }
 0x210   :  { %v150_v58 = vmul.f32 %v2080_v57, %v2256_v43  ;;  %v149_v59 = vmul.f32 %v2080_v57, %v2254_v42  ;;  %v1957_v42 = vld [vmem:[%s2765_s6 + $0x28] ss:$16 sps:$4 sm:$0xff]   ;;  %v1965_v43 = vld [vmem:[%s2765_s6 + $0x4c] ss:$16 sps:$4 sm:$0xff]   ;;  %v1006_v57 = vld [vmem:[%s2768_s8 + $0xb0] sm:$0xff] }
 0x212   :  { %v163_v60 = vmul.f32 %v159_v41, %v150_v58  ;;  %v162_v61 = vmul.f32 %v155_v45, %v149_v59  ;;  %v1001_v41 = vld [vmem:[%s2768_s8 + $0x88] sm:$0xff]  ;;  %v1007_v58 = vld [vmem:[%s2768_s8 + $0xb8] sm:$0xff]  ;;  %v1861_v59 = vpack.c.bf16 %v989_v56, %v988_v55  ;;  %v1173_v56 = vld [vmem:[%s2771_s9] sm:$0xff] }
 0x213   :  { %v1851_v45 = vpack.c.bf16 %v1001_v41, %v1000_v40  ;;  %v1174_v55 = vld [vmem:[%s2771_s9 + $0x8] sm:$0xff] }
 0x214   :  { %v176_v62 = vadd.f32 %v172_v46, %v163_v60  ;;  %v175_v63 = vadd.f32 %v168_v16, %v162_v61  ;;  %v985_v46 = vld [vmem:[%s2768_s8 + $0x8] sm:$0xff]  ;;  %v1003_v16 = vld [vmem:[%s2768_s8 + $0x98] sm:$0xff]  ;;  %v1863_v60 = vpack.c.bf16 %v1007_v58, %v1006_v57  ;;  %v990_v61 = vld [vmem:[%s2768_s8 + $0x30] sm:$0xff] }
 0x215   :  { %v1853_v48 = vpack.c.bf16 %v985_v46, %v984_v44  ;;  %v1855_v49 = vpack.c.bf16 %v1003_v16, %v1002_v47 }
 0x216   :  { %v198_v0 = vpack.c.bf16 %v176_v62, %v176_v62  ;;  %v197_v3 = vpack.c.bf16 %v175_v63, %v175_v63  ;;  %v991_v62 = vld [vmem:[%s2768_s8 + $0x38] sm:$0xff]  ;;  %v1008_v63 = vld [vmem:[%s2768_s8 + $0xc0] sm:$0xff] }
 0x218   :  { %423 = vmatprep.mubr.bf16.mxu1 %v198_v0  ;;  %v1009_v0 = vld [vmem:[%s2768_s8 + $0xc8] sm:$0xff] }
 0x219   :  { %424 = vmatmul.mubr.bf16.vlgmr.msra.gmra.mrb[0].mxu1 %v197_v3  ;;  %v1867_v3 = vpack.c.bf16 %v1009_v0, %v1008_v63 }
 0x21a   :  { %860 = vmatpush1.bf16.msra.mxu1 %v1951_v1  ;;  %891 = vmatprep.mubr.bf16.mxu1 %v433_v52  ;;  %v1005_v52 = vld [vmem:[%s2768_s8 + $0xa8] sm:$0xff]  ;;  %v1865_v1 = vpack.c.bf16 %v991_v62, %v990_v61 }
 0x21b   :  { %861 = vmatprep.subr.bf16.mxu1 %v1959_v4  ;;  %v1859_v54 = vpack.c.bf16 %v1005_v52, %v1004_v17  ;;  %v992_v4 = vld [vmem:[%s2768_s8 + $0x40] sm:$0xff] }
 0x21e   :  { %862 = vmatpush1.bf16.msra.mxu1 %v1957_v42  ;;  %v993_v42 = vld [vmem:[%s2768_s8 + $0x48] sm:$0xff] }
 0x21f   :  { %863 = vmatprep.subr.bf16.mxu1 %v1965_v43  ;;  %v1010_v43 = vld [vmem:[%s2768_s8 + $0xd0] sm:$0xff] }
 0x222   :  { %864 = vmatpush1.bf16.msra.mxu1 %v1963_v5  ;;  %v1011_v5 = vld [vmem:[%s2768_s8 + $0xd8] sm:$0xff] }
 0x223   :  { %865 = vmatprep.subr.bf16.mxu1 %v1971_v6  ;;  %v1869_v6 = vpack.c.bf16 %v993_v42, %v992_v4  ;;  %v2029_v4 = vld [vmem:[%s2772_s12] ss:$8 sps:$4 sm:$0xff]   ;;  %v2034_v42 = vld [vmem:[%s2772_s12 + $0x14] ss:$8 sps:$4 sm:$0xff]  }
 0x226   :  { %866 = vmatpush1.bf16.msra.mxu1 %v1969_v7  ;;  %v1871_v7 = vpack.c.bf16 %v1011_v5, %v1010_v43  ;;  %v2032_v43 = vld [vmem:[%s2772_s12 + $0x10] ss:$8 sps:$4 sm:$0xff]   ;;  %v2037_v5 = vld [vmem:[%s2772_s12 + $0x24] ss:$8 sps:$4 sm:$0xff]  }
 0x227   :  { %867 = vmatprep.subr.bf16.mxu1 %v1977_v8  ;;  %v994_v8 = vld [vmem:[%s2768_s8 + $0x50] sm:$0xff] }
 0x22a   :  { %868 = vmatpush1.bf16.msra.mxu1 %v1975_v9  ;;  %v995_v9 = vld [vmem:[%s2768_s8 + $0x58] sm:$0xff] }
 0x22b   :  { %869 = vmatprep.subr.bf16.mxu1 %v1983_v10  ;;  %v1012_v10 = vld [vmem:[%s2768_s8 + $0xe0] sm:$0xff] }
 0x22e   :  { %870 = vmatpush1.bf16.msra.mxu1 %v1981_v11  ;;  %v1013_v11 = vld [vmem:[%s2768_s8 + $0xe8] sm:$0xff] }
 0x22f   :  { %871 = vmatprep.subr.bf16.mxu1 %v1989_v12  ;;  %v1873_v12 = vpack.c.bf16 %v995_v9, %v994_v8  ;;  %v2038_v8 = vld [vmem:[%s2772_s12 + $0x30] ss:$8 sps:$4 sm:$0xff]   ;;  %v2043_v9 = vld [vmem:[%s2772_s12 + $0x44] ss:$8 sps:$4 sm:$0xff]  }
 0x232   :  { %872 = vmatpush1.bf16.msra.mxu1 %v1987_v13  ;;  %v1875_v13 = vpack.c.bf16 %v1013_v11, %v1012_v10  ;;  %v2041_v10 = vld [vmem:[%s2772_s12 + $0x40] ss:$8 sps:$4 sm:$0xff]   ;;  %v2046_v11 = vld [vmem:[%s2772_s12 + $0x54] ss:$8 sps:$4 sm:$0xff]  }
 0x233   :  { %873 = vmatprep.subr.bf16.mxu1 %v1995_v14  ;;  %v996_v14 = vld [vmem:[%s2768_s8 + $0x60] sm:$0xff] }
 0x236   :  { %874 = vmatpush1.bf16.msra.mxu1 %v1993_v15  ;;  %v997_v15 = vld [vmem:[%s2768_s8 + $0x68] sm:$0xff] }
 0x237   :  { %875 = vmatprep.subr.bf16.mxu1 %v2001_v18  ;;  %v1877_v18 = vpack.c.bf16 %v997_v15, %v996_v14  ;;  %v2047_v14 = vld [vmem:[%s2772_s12 + $0x60] ss:$8 sps:$4 sm:$0xff]   ;;  %v2052_v15 = vld [vmem:[%s2772_s12 + $0x74] ss:$8 sps:$4 sm:$0xff]  }
 0x23a   :  { %876 = vmatpush1.bf16.msra.mxu1 %v1999_v19 }
 0x23b   :  { %877 = vmatprep.subr.bf16.mxu1 %v2007_v20 }
 0x23e   :  { %878 = vmatpush1.bf16.msra.mxu1 %v2005_v21  ;;  %v2603_v21 = vld [vmem:[%s2769_s7] sm:$0xff] }
 0x23f   :  { %879 = vmatprep.subr.bf16.mxu1 %v2013_v22 }
 0x242   :  { %880 = vmatpush1.bf16.msra.mxu1 %v2011_v23 }
 0x243   :  { %881 = vmatprep.subr.bf16.mxu1 %v2016_v24 }
 0x246   :  { %882 = vmatpush1.bf16.msra.mxu1 %v2014_v25 }
 0x247   :  { %883 = vmatprep.subr.bf16.mxu1 %v2019_v26 }
 0x24a   :  { %884 = vmatpush1.bf16.msra.mxu1 %v2017_v27 }
 0x24b   :  { %885 = vmatprep.subr.bf16.mxu1 %v2022_v28  ;;  %v1014_v28 = vld [vmem:[%s2768_s8 + $0xf0] sm:$0xff] }
 0x24e   :  { %886 = vmatpush1.bf16.msra.mxu1 %v2020_v29  ;;  %v1015_v29 = vld [vmem:[%s2768_s8 + $0xf8] sm:$0xff] }
 0x24f   :  { %887 = vmatprep.subr.bf16.mxu1 %v2025_v30  ;;  %v1879_v30 = vpack.c.bf16 %v1015_v29, %v1014_v28  ;;  %v2067_v28 = vld [vmem:[%s2772_s12 + $0xc4] ss:$8 sps:$4 sm:$0xff]   ;;  %v2065_v29 = vld [vmem:[%s2772_s12 + $0xc0] ss:$8 sps:$4 sm:$0xff]  }
 0x252   :  { %888 = vmatpush1.bf16.msra.mxu1 %v2023_v31  ;;  %v998_v31 = vld [vmem:[%s2768_s8 + $0x70] sm:$0xff] }
 0x253   :  { %889 = vmatprep.subr.bf16.mxu1 %v2028_v32  ;;  %v999_v32 = vld [vmem:[%s2768_s8 + $0x78] sm:$0xff] }
 0x256   :  { %890 = vmatpush1.bf16.msra.mxu1 %v2026_v34  ;;  %v1881_v34 = vpack.c.bf16 %v999_v32, %v998_v31  ;;  %v2068_v31 = vld [vmem:[%s2772_s12 + $0xd0] ss:$8 sps:$4 sm:$0xff]   ;;  %v2073_v32 = vld [vmem:[%s2772_s12 + $0xe4] ss:$8 sps:$4 sm:$0xff]  }
 0x257   :  { %1852 = vmatprep.subr.bf16.mxu1 %v1851_v45 }
 0x259   :  { %892 = vmatmul.mubr.bf16.vlgmr.msra.gmra.mrb[4].mxu1 %v2412_v53  ;;  %v1857_v53 = vpack.c.bf16 %v987_v51, %v986_v50 }
 0x25a   :  { %1854 = vmatpush3.bf16.msra.mxu1 %v1853_v48 }
 0x25b   :  { %1856 = vmatprep.subr.bf16.mxu1 %v1855_v49 }
 0x25e   :  { %1858 = vmatpush3.bf16.msra.mxu1 %v1857_v53 }
 0x25f   :  { %1860 = vmatprep.subr.bf16.mxu1 %v1859_v54 }
 0x262   :  { %1862 = vmatpush3.bf16.msra.mxu1 %v1861_v59 }
 0x263   :  { %1864 = vmatprep.subr.bf16.mxu1 %v1863_v60 }
 0x266   :  { %1866 = vmatpush3.bf16.msra.mxu1 %v1865_v1  ;;  %v2031_v1 = vld [vmem:[%s2772_s12 + $0x4] ss:$8 sps:$4 sm:$0xff]  }
 0x267   :  { %1868 = vmatprep.subr.bf16.mxu1 %v1867_v3  ;;  %v1249_v3 = vld [vmem:[%s2773_s10] sm:$0x3] }
 0x26a   :  { %1870 = vmatpush3.bf16.msra.mxu1 %v1869_v6  ;;  %v2035_v6 = vld [vmem:[%s2772_s12 + $0x20] ss:$8 sps:$4 sm:$0xff]  }
 0x26b   :  { %1872 = vmatprep.subr.bf16.mxu1 %v1871_v7  ;;  %v2040_v7 = vld [vmem:[%s2772_s12 + $0x34] ss:$8 sps:$4 sm:$0xff]  }
 0x26c   :  { %v2512_v36 = vpop.f32.mrb[4].mxu0 }
 0x26d   :  { %v2514_v37 = vpop.f32.mrb[5].mxu0 }
 0x26e   :  { %v856_v38 = vpop.f32.mrb[6].mxu0  ;;  %1874 = vmatpush3.bf16.msra.mxu1 %v1873_v12  ;;  %v2044_v12 = vld [vmem:[%s2772_s12 + $0x50] ss:$8 sps:$4 sm:$0xff]  }
 0x26f   :  { %v857_v39 = vpop.f32.mrb[7].mxu0  ;;  %1876 = vmatprep.subr.bf16.mxu1 %v1875_v13  ;;  %v2049_v13 = vld [vmem:[%s2772_s12 + $0x64] ss:$8 sps:$4 sm:$0xff]  }
 0x272   :  { %1878 = vmatpush3.bf16.msra.mxu1 %v1877_v18  ;;  %v2050_v18 = vld [vmem:[%s2772_s12 + $0x70] ss:$8 sps:$4 sm:$0xff]  }
 0x273   :  { %1880 = vmatprep.subr.bf16.mxu1 %v1879_v30  ;;  %v2070_v30 = vld [vmem:[%s2772_s12 + $0xd4] ss:$8 sps:$4 sm:$0xff]  }
 0x276   :  { %1882 = vmatpush3.bf16.msra.mxu1 %v1881_v34  ;;  %v2071_v34 = vld [vmem:[%s2772_s12 + $0xe0] ss:$8 sps:$4 sm:$0xff]  }
 0x2ec   :  { %v425_v19 = vpop.f32.mrb[0].mxu1 }
 0x2ed   :  { %v427_v20 = vpop.f32.mrb[1].mxu1 }
 0x2ee   :  { %v429_v22 = vpop.f32.mrb[2].mxu1  ;;  %1767 = vmatprep.subr.msk.mxu0 %vm129_vm1, %v427_v20  ;;  %v2053_v20 = vld [vmem:[%s2772_s12 + $0x80] ss:$8 sps:$4 sm:$0xff]  }
 0x2ef   :  { %v430_v23 = vpop.f32.mrb[3].mxu1  ;;  %1768 = vmatpush1.msk.msra.mxu0 %vm129_vm1, %v425_v19  ;;  %v2055_v19 = vld [vmem:[%s2772_s12 + $0x84] ss:$8 sps:$4 sm:$0xff]   ;;  %v2058_v22 = vld [vmem:[%s2772_s12 + $0x94] ss:$8 sps:$4 sm:$0xff]  }
 0x2f0   :  { %1769 = vmatmul.mubr.msk.f32.vlgmr.msra.gmra.mrb[2].mxu0 %vm901_vm2, %v2603_v21  ;;  %1846 = vmatprep.subr.mxu0 %v2087_v2  ;;  %v2056_v23 = vld [vmem:[%s2772_s12 + $0x90] ss:$8 sps:$4 sm:$0xff]  }
 0x2f1   :  { %1848 = vmatprep.mubr.msk.f32.mxu0 %vm2088_vm3, %v2087_v2 }
 0x32c   :  { %v893_v24 = vpop.f32.mrb[4].mxu1 }
 0x32d   :  { %v895_v25 = vpop.f32.mrb[5].mxu1 }
 0x32e   :  { %v897_v26 = vpop.f32.mrb[6].mxu1 }
 0x32f   :  { %v898_v27 = vpop.f32.mrb[7].mxu1  ;;  %v2064_v26 = vld [vmem:[%s2772_s12 + $0xb4] ss:$8 sps:$4 sm:$0xff]  }
 0x330   :  { %v2062_v27 = vld [vmem:[%s2772_s12 + $0xb0] ss:$8 sps:$4 sm:$0xff]  }
 0x3c3   :  { %v977_v38 = vpop.f32.mrb[2].mxu0 }
 0x3c4   :  { %v982_v39 = vmul.f32 %v977_v38, %v2512_v36  ;;  %v979_v40 = vpop.f32.mrb[3].mxu0  ;;  %v2076_v38 = vld [vmem:[%s2772_s12 + $0xf4] ss:$8 sps:$4 sm:$0xff]  }
 0x3c5   :  { %v983_v41 = vmul.f32 %v979_v40, %v2514_v37  ;;  %v1097_v37 = vld [vmem:[%s2770_s11] sm:$0xff] }
 0x3c7   :  { %1080 = vmatprep.mubr.f32.mxu1 %v983_v41 }
 0x3c8   :  { %1081 = vmatmul.mubr.f32.vlgmr.msra.gmra.mrb[8].mxu1 %v982_v39  ;;  %v2074_v39 = vld [vmem:[%s2772_s12 + $0xf0] ss:$8 sps:$4 sm:$0xff]  }
 0x49b   :  { %v1841_v44 = vpop.f32.mrb[8].mxu1 }
 0x49c   :  { %v1842_v45 = vpop.f32.mrb[9].mxu1 }
 0x49d   :  { %v1843_v46 = vadd.f32 %v1842_v45, %v1841_v44 }
 0x49f   :  { %v1086_v47 = vmul.f32 0.17677669, %v1843_v46 }
 0x4a1   :  { %v1087_v16 = vsel %vm52_vm0, %v1086_v47, -inf }
 0x4a2   :  { %v1088_v48 = vrot.slane %v1087_v16, 4 }
 0x4a4   :  { %v1089_v49 = vmax.f32 %v1087_v16, %v1088_v48 }
 0x4a6   :  { %v1090_v50 = vrot.slane %v1089_v49, 2 }
 0x4a8   :  { %v1091_v51 = vmax.f32 %v1089_v49, %v1090_v50  ;;  %v1372_v49 = vld [vmem:[%s2774_s13] sm:$0x3] }
 0x4a9   :  { %v1381_v50 = vrot.slane %v1372_v49, %v2384_v33  ;;  %v2085_v33 = vld [vmem:[%s2763_s1] sm:$0xff] }
 0x4aa   :  { %v1092_v17 = vrot.slane %v1091_v51, 1 }
 0x4ac   :  { %v1093_v36 = vmax.f32 %v1091_v51, %v1092_v17  ;;  %v1377_v51 = vrot.slane %v1372_v49, %v2389_v35 }
 0x4ae   :  { %v1094_v52 = vsub.f32 %v1086_v47, %v1093_v36 }
 0x4b0   :  { %v1095_v53 = vmul.f32 1.442695, %v1094_v52 }
 0x4b2   :  { %2081 = vpow2.f32 %v1095_v53 }
 0x4bc   :  { %v2082_v54 = vpop.eup %2081 }
 0x4bd   :  { %1847 = vmatpush3.msra.mxu0 %v2082_v54 }
 0x4be   :  { %1849 = vmatmul.mubr.msk.f32.vlgmr.msra.gmra.mrb[8].mxu0 %vm52_vm0, %v1097_v37  ;;  %1178 = vmatprep.subr.mxu0 %v1174_v55 }
 0x4bf   :  { %1242 = vmatprep.mubr.f32.mxu0 %v2087_v2  ;;  %1179 = vmatpush1.msra.mxu0 %v1173_v56  ;;  %v2086_v56 = vld [vmem:[%s2763_s1 + $0x8] sm:$0xff] }
 0x591   :  { %v1167_v57 = vpop.f32.mrb[8].mxu0 }
 0x592   :  { %2083 = vrcp.f32 %v1167_v57  ;;  %v1850_v58 = vpop.f32.mrb[9].mxu0 }
 0x59c   :  { %v2084_v59 = vpop.eup %2083 }
 0x59d   :  { %v1172_v60 = vmul.f32 %v2084_v59, %v2082_v54 }
 0x59f   :  { %1771 = vmatmul.mubr.msk.f32.vlgmr.msra.gmra.mrb[10].mxu0 %vm52_vm0, %v1172_v60 }
 0x5a0   :  { %1319 = vmatprep.mubr.f32.mxu0 %v2087_v2 }
 0x672   :  { %v1244_v61 = vpop.f32.mrb[10].mxu0 }
 0x673   :  { %v1250_v62 = vmul.f32 %v1244_v61, %v893_v24  ;;  %v1246_v63 = vpop.f32.mrb[11].mxu0  ;;  %v2061_v24 = vld [vmem:[%s2772_s12 + $0xa4] ss:$8 sps:$4 sm:$0xff]  }
 0x674   :  { %v1251_v0 = vmul.f32 %v1246_v63, %v895_v25  ;;  %v2059_v25 = vld [vmem:[%s2772_s12 + $0xa0] ss:$8 sps:$4 sm:$0xff]  }
 0x676   :  { %1255 = vmatprep.subr.mxu0 %v1251_v0 }
 0x677   :  { %1256 = vmatpush1.msra.mxu0 %v1250_v62 }
 0x678   :  { %1772 = vmatmul.mubr.msk.f32.vlgmr.msra.gmra.mrb[12].mxu0 %vm52_vm0, %v1249_v3  ;;  %1544 = vmatprep.subr.bf16.mxu0 %v2031_v1 }
 0x679   :  { %1545 = vmatpush1.bf16.msra.mxu0 %v2029_v4 }
 0x67a   :  { %1546 = vmatprep.subr.bf16.mxu0 %v2034_v42 }
 0x67d   :  { %1547 = vmatpush1.bf16.msra.mxu0 %v2032_v43 }
 0x67e   :  { %1548 = vmatprep.subr.bf16.mxu0 %v2037_v5 }
 0x681   :  { %1549 = vmatpush1.bf16.msra.mxu0 %v2035_v6 }
 0x682   :  { %1550 = vmatprep.subr.bf16.mxu0 %v2040_v7 }
 0x685   :  { %1551 = vmatpush1.bf16.msra.mxu0 %v2038_v8 }
 0x686   :  { %1552 = vmatprep.subr.bf16.mxu0 %v2043_v9 }
 0x689   :  { %1553 = vmatpush1.bf16.msra.mxu0 %v2041_v10 }
 0x68a   :  { %1554 = vmatprep.subr.bf16.mxu0 %v2046_v11 }
 0x68d   :  { %1555 = vmatpush1.bf16.msra.mxu0 %v2044_v12 }
 0x68e   :  { %1556 = vmatprep.subr.bf16.mxu0 %v2049_v13 }
 0x691   :  { %1557 = vmatpush1.bf16.msra.mxu0 %v2047_v14 }
 0x692   :  { %1558 = vmatprep.subr.bf16.mxu0 %v2052_v15 }
 0x695   :  { %1559 = vmatpush1.bf16.msra.mxu0 %v2050_v18 }
 0x696   :  { %1560 = vmatprep.subr.bf16.mxu0 %v2055_v19 }
 0x699   :  { %1561 = vmatpush1.bf16.msra.mxu0 %v2053_v20 }
 0x69a   :  { %1562 = vmatprep.subr.bf16.mxu0 %v2058_v22 }
 0x69d   :  { %1563 = vmatpush1.bf16.msra.mxu0 %v2056_v23 }
 0x69e   :  { %1564 = vmatprep.subr.bf16.mxu0 %v2061_v24 }
 0x6a1   :  { %1565 = vmatpush1.bf16.msra.mxu0 %v2059_v25 }
 0x6a2   :  { %1566 = vmatprep.subr.bf16.mxu0 %v2064_v26 }
 0x6a5   :  { %1567 = vmatpush1.bf16.msra.mxu0 %v2062_v27 }
 0x6a6   :  { %1568 = vmatprep.subr.bf16.mxu0 %v2067_v28 }
 0x6a9   :  { %1569 = vmatpush1.bf16.msra.mxu0 %v2065_v29 }
 0x6aa   :  { %1570 = vmatprep.subr.bf16.mxu0 %v2070_v30 }
 0x6ad   :  { %1571 = vmatpush1.bf16.msra.mxu0 %v2068_v31 }
 0x6ae   :  { %1572 = vmatprep.subr.bf16.mxu0 %v2073_v32 }
 0x6b1   :  { %1573 = vmatpush1.bf16.msra.mxu0 %v2071_v34 }
 0x6b2   :  { %1574 = vmatprep.subr.bf16.mxu0 %v2076_v38 }
 0x6b5   :  { %1575 = vmatpush1.bf16.msra.mxu0 %v2074_v39 }
 0x74b   :  { %v1321_v40 = vpop.f32.mrb[12].mxu0 }
 0x74c   :  { %v1327_v41 = vrot.slane %v1321_v40, 1  ;;  %v1323_v44 = vpop.f32.mrb[13].mxu0 }
 0x74d   :  { %v1331_v45 = vrot.slane %v1323_v44, 7 }
 0x74e   :  { %v1337_v46 = vsel %vm1335_vm4, %v1327_v41, %v1323_v44 }
 0x74f   :  { %v1336_v47 = vsel %vm1335_vm4, %v1321_v40, %v1331_v45  ;;  %v1339_v16 = vpack.c.bf16 %v1337_v46, %v1337_v46 }
 0x750   :  { %v1338_v48 = vpack.c.bf16 %v1336_v47, %v1336_v47 }
 0x751   :  { %1576 = vmatprep.mubr.bf16.mxu0 %v1339_v16 }
 0x752   :  { %1577 = vmatmul.mubr.bf16.vlgmr.msra.gmra.mrb[16].mxu0 %v1338_v48 }
 0x753   :  { %1655 = vmatprep.mubr.f32.mxu0 %v2087_v2 }
 0x825   :  { %v1578_v17 = vpop.f32.mrb[16].mxu0 }
 0x826   :  { %v1580_v36 = vpop.f32.mrb[17].mxu0  ;;  %v1579_v37 = vadd.f32 %v1578_v17, %v1377_v51 }
 0x827   :  { %v1581_v52 = vadd.f32 %v1580_v36, %v1381_v50  ;;  %v1582_v53 = vpop.f32.mrb[18].mxu0 }
 0x828   :  { %v1583_v54 = vpop.f32.mrb[19].mxu0 }
 0x829   :  { %1806 = vmatprep.subr.msk.mxu0 %vm129_vm1, %v1581_v52 }
 0x82a   :  { %1807 = vmatpush1.msk.msra.mxu0 %vm129_vm1, %v1579_v37 }
 0x82b   :  { %1808 = vmatmul.mubr.msk.f32.vlgmr.msra.gmra.mrb[14].mxu0 %vm901_vm2, %v2603_v21 }
 0x8fe   :  { %v1657_v2 = vpop.f32.mrb[14].mxu0 }
 0x8ff   :  { %v1662_v55 = vmul.f32 %v2085_v33, %v1657_v2  ;;  %v1659_v35 = vpop.f32.mrb[15].mxu0 }
 0x900   :  { %v1663_v57 = vmul.f32 %v2086_v56, %v1659_v35 }
 0x901   :  { %1664 = vst [vmem:[%s2775_s14] sm:$0xff] %v1662_v55 }
 0x902   :  { %1665 = vst [vmem:[%s2775_s14 + $0x8] sm:$0xff] %v1663_v57 }

</bundles_post_ra>
